<compile_context>
chip_gen: v6e
topology: v6e:2x2x1
jax: 0.10.0
libtpu: 0.0.40
codegen_flags: <defaults>
</compile_context>

<pallas_src>
import functools

import jax
import jax.numpy as jnp
from jax.experimental import pallas as pl
from jax.experimental.pallas import tpu as pltpu

SELU_ALPHA = 1.6732632423543772
SELU_LAMBDA = 1.0507009873554805


def _selu(x):
    return SELU_LAMBDA * jnp.where(x > 0, x, SELU_ALPHA * (jnp.exp(x) - 1.0))


# --------------------------------- kernel ----------------------------------
def _dense_unit_kernel(K, dilation, pad,
                       x_ref, w1_ref, w2_ref, w3_ref, w4_ref,
                       ptab_ref, lpos_ref, out_ref):
    B, L, c_in = x_ref.shape
    c4 = w3_ref.shape[1]
    c_out = out_ref.shape[2]
    M = B * L

    # per-row position inside each batch element (precomputed on host, int32)
    lpos = lpos_ref[...]                                  # (M, 1)

    # packed per-channel parameter table
    b1 = ptab_ref[0, 0:c_in]
    b2 = ptab_ref[1, 0:c4]
    b3 = ptab_ref[2, 0:c4]
    b4 = ptab_ref[3, 0:c_out]
    A1 = ptab_ref[4, 0:c4]
    B1 = ptab_ref[5, 0:c4]
    A2 = ptab_ref[6, 0:c_out]
    B2 = ptab_ref[7, 0:c_out]

    def depthwise(y, w_ref, bias):
        # y: (M, C) f32.  SAME-padding depthwise conv via sublane rolls (XLU)
        # + masking of the halo rows (replaces padded scratch + shifted reads).
        acc = None
        for k in range(K):
            off = k * dilation - pad                      # static python int
            if off == 0:
                tap = y
            else:
                tap = pltpu.roll(y, shift=(-off) % M, axis=0)
                valid = jnp.logical_and(lpos + off >= 0, lpos + off < L)
                tap = jnp.where(valid, tap, 0.0)
            term = tap * w_ref[k, :][None, :]
            acc = term if acc is None else acc + term
        return acc + bias[None, :]

    def norm_selu(y, A, Bv):
        # Normalizer (channelNorm over lanes) in eval mode; moving stats and
        # affine already folded into (A, Bv).  All math kept in f32 (VPU/EUP).
        C = y.shape[1]
        m = jnp.mean(y, axis=1, keepdims=True)            # lane reduction (XLU)
        d = y - m
        std = jnp.sqrt(jnp.sum(d * d, axis=1, keepdims=True) / (C - 1))
        inv = 1.0 / (std + 1e-5)                          # (M,1) only -> cheap
        y = (d * inv) * A[None, :] + Bv[None, :]
        return _selu(y)

    x = x_ref[...].reshape(M, c_in)                       # f32

    # conv1 (depthwise) -> conv2 (pointwise, MXU, bf16 operands / f32 acc)
    y = depthwise(x, w1_ref, b1)
    y = jnp.dot(y.astype(jnp.bfloat16), w2_ref[...],
                preferred_element_type=jnp.float32) + b2[None, :]
    y = norm_selu(y, A1, B1)

    # conv3 (depthwise) -> conv4 (pointwise)
    y = depthwise(y, w3_ref, b3)
    y = jnp.dot(y.astype(jnp.bfloat16), w4_ref[...],
                preferred_element_type=jnp.float32) + b4[None, :]
    y = norm_selu(y, A2, B2)

    # lane-dense single store of the new channels only (x concat in wrapper)
    out_ref[...] = y.reshape(B, L, c_out).astype(out_ref.dtype)


# --------------------------------- wrapper ---------------------------------
def seperable_densenet_unit(x, params, *, kernel_size, dilation,
                            down_sampling=0, batch_tile=None):
    """x: (N, C_in, L) float32 in PyTorch NCL layout."""
    (w1, b1, w2, b2, w3, b3, w4, b4,
     s1, be1, ma1, mv1, s2, be2, ma2, mv2) = params
    N, c_in, L = x.shape
    c4 = w2.shape[0]
    c_out = w4.shape[0]
    K = kernel_size
    pad = (K + (K - 1) * (dilation - 1) - 1) // 2
    assert (K + (K - 1) * (dilation - 1)) % 2 == 1, \
        "SAME-length path assumes an odd effective kernel size"

    # batch tile: fuse batch elements to grow the MXU M dimension / cut steps
    if batch_tile is None:
        batch_tile = max(1, min(N, 512 // max(L, 1)))
        while N % batch_tile:
            batch_tile -= 1
    B_tile = batch_tile
    M = B_tile * L

    # ---- glue: layout + weight reshapes (weights for the MXU ship as bf16) --
    x_nlc = jnp.transpose(x, (0, 2, 1)).astype(jnp.float32)        # (N, L, c_in)
    w1k = jnp.transpose(w1[:, 0, :], (1, 0)).astype(jnp.float32)   # (K, c_in)
    w3k = jnp.transpose(w3[:, 0, :], (1, 0)).astype(jnp.float32)   # (K, c4)
    w2k = jnp.transpose(w2[:, :, 0], (1, 0)).astype(jnp.bfloat16)  # (c_in, c4)
    w4k = jnp.transpose(w4[:, :, 0], (1, 0)).astype(jnp.bfloat16)  # (c4, c_out)

    # fold eval-mode moving stats + affine into per-channel scale/shift
    A1 = jnp.abs(s1) / (jnp.sqrt(mv1) + 1e-5)
    B1 = be1 - ma1 * A1
    A2 = jnp.abs(s2) / (jnp.sqrt(mv2) + 1e-5)
    B2 = be2 - ma2 * A2

    cmax = max(c_in, c4, c_out)
    rowpad = lambda v: jnp.pad(v.astype(jnp.float32), (0, cmax - v.shape[0]))
    ptab = jnp.stack([rowpad(b1), rowpad(b2), rowpad(b3), rowpad(b4),
                      rowpad(A1), rowpad(B1), rowpad(A2), rowpad(B2)])  # (8, cmax)

    lpos = jnp.tile(jnp.arange(L, dtype=jnp.int32), B_tile).reshape(M, 1)

    # cost estimate + VMEM budget (re-derived; v7x has only 64 MiB per TC)
    flops = int(2 * N * L * (c_in * c4 + c4 * c_out + K * (c_in + c4))
                + 10 * N * L * (c4 + c_out))
    transcendentals = int(N * L * (c4 + c_out + 2))
    bytes_accessed = int(4 * (x_nlc.size + N * L * c_out + w1k.size + w3k.size
                              + ptab.size + lpos.size)
                         + 2 * (w2k.size + w4k.size))
    tile_bytes = 4 * B_tile * L * (c_in + c_out)                 # in/out tiles
    work_bytes = 4 * B_tile * L * (3 * c4 + 2 * c_in + 2 * c_out)
    const_bytes = 4 * (w1k.size + w3k.size + ptab.size + lpos.size) \
        + 2 * (w2k.size + w4k.size)
    vmem_budget = int(min(64 * 2**20,
                          max(8 * 2**20, 4 * (2 * tile_bytes + work_bytes
                                              + const_bytes))))

    grid = (N // B_tile,)
    kernel = functools.partial(_dense_unit_kernel, K, dilation, pad)

    out_nlc = pl.pallas_call(
        kernel,
        out_shape=jax.ShapeDtypeStruct((N, L, c_out), jnp.float32),
        grid_spec=pltpu.PrefetchScalarGridSpec(
            num_scalar_prefetch=0,
            grid=grid,
            in_specs=[
                pl.BlockSpec((B_tile, L, c_in), lambda n: (n, 0, 0)),  # x
                pl.BlockSpec((K, c_in), lambda n: (0, 0)),             # w1 (dw)
                pl.BlockSpec((c_in, c4), lambda n: (0, 0)),            # w2 (pw)
                pl.BlockSpec((K, c4), lambda n: (0, 0)),               # w3 (dw)
                pl.BlockSpec((c4, c_out), lambda n: (0, 0)),           # w4 (pw)
                pl.BlockSpec((8, cmax), lambda n: (0, 0)),             # param table
                pl.BlockSpec((M, 1), lambda n: (0, 0)),                # row positions
            ],
            out_specs=pl.BlockSpec((B_tile, L, c_out), lambda n: (n, 0, 0)),
        ),
        compiler_params=pltpu.CompilerParams(
            dimension_semantics=("parallel",),       # batch tiles are independent
            vmem_limit_bytes=vmem_budget,
        ),
        cost_estimate=pl.CostEstimate(flops=flops,
                                      transcendentals=transcendentals,
                                      bytes_accessed=bytes_accessed),
    )(x_nlc, w1k, w2k, w3k, w4k, ptab, lpos)

    # torch.cat((y, x), dim=1) done lane-dense in the wrapper, not the kernel
    y = jnp.transpose(out_nlc, (0, 2, 1))                         # (N, c_out, L)
    y = jnp.concatenate([y, x.astype(jnp.float32)], axis=1)
    if down_sampling:                                             # F.max_pool1d
        k = down_sampling
        Lp = y.shape[-1] // k
        y = y[:, :, :Lp * k].reshape(y.shape[0], y.shape[1], Lp, k).max(axis=-1)
    return y


# ------------------------- pure-JAX reference ------------------------------
def ref_forward(x, params, *, kernel_size, dilation, down_sampling=0,
                matmul_dtype=jnp.float32):
    """matmul_dtype=f32: exact module semantics (eval mode).
    matmul_dtype=bf16: same operand rounding as the TPU kernel's MXU path."""
    (w1, b1, w2, b2, w3, b3, w4, b4,
     s1, be1, ma1, mv1, s2, be2, ma2, mv2) = params
    K = kernel_size
    pad = (K + (K - 1) * (dilation - 1) - 1) // 2
    N, c_in, L = x.shape

    def depthwise(y_nlc, w, b):                      # w: (C, 1, K) torch layout
        ypad = jnp.pad(y_nlc, ((0, 0), (pad, pad), (0, 0)))
        acc = jnp.zeros_like(y_nlc)
        for k in range(K):
            acc = acc + ypad[:, k * dilation:k * dilation + L, :] * w[:, 0, k][None, None, :]
        return acc + b[None, None, :]

    def pointwise(y_nlc, w, b):                      # w: (O, C, 1)
        wk = jnp.transpose(w[:, :, 0], (1, 0)).astype(matmul_dtype)
        return jnp.dot(y_nlc.astype(matmul_dtype), wk,
                       preferred_element_type=jnp.float32) + b[None, None, :]

    def norm_eval(y, scale, bias, ma, mv):
        C = y.shape[-1]
        m = jnp.mean(y, axis=-1, keepdims=True)
        d = y - m
        std = jnp.sqrt(jnp.sum(d * d, axis=-1, keepdims=True) / (C - 1))
        yn = d / (std + 1e-5)
        yn = (yn - ma[None, None, :]) / (jnp.sqrt(mv)[None, None, :] + 1e-5)
        return yn * jnp.abs(scale)[None, None, :] + bias[None, None, :]

    x_nlc = jnp.transpose(x, (0, 2, 1)).astype(jnp.float32)
    y = depthwise(x_nlc, w1, b1)
    y = _selu(norm_eval(pointwise(y, w2, b2), s1, be1, ma1, mv1))
    y = depthwise(y, w3, b3)
    y = _selu(norm_eval(pointwise(y, w4, b4), s2, be2, ma2, mv2))
    y = jnp.transpose(y, (0, 2, 1))
    y = jnp.concatenate([y, x], axis=1)
    if down_sampling:
        k = down_sampling
        Lp = y.shape[-1] // k
        y = y[:, :, :Lp * k].reshape(y.shape[0], y.shape[1], Lp, k).max(axis=-1)
    return y


# ---------------------- deterministic parameter init -----------------------
def init_params(key, in_channels, out_channels, kernel_size):
    c4 = 4 * out_channels
    ks = jax.random.split(key, 8)

    def weight_norm(v):
        # nn.utils.weight_norm: w = g * v / ||v|| (norm over dims 1,2); g = ||v|| at init.
        nrm = jnp.sqrt(jnp.sum(v * v, axis=(1, 2), keepdims=True))
        return nrm * v / nrm

    w1 = weight_norm(0.3 * jax.random.normal(ks[0], (in_channels, 1, kernel_size), jnp.float32))
    b1 = 0.1 * jax.random.normal(ks[1], (in_channels,), jnp.float32)
    w2 = weight_norm(0.3 * jax.random.normal(ks[2], (c4, in_channels, 1), jnp.float32))
    b2 = 0.1 * jax.random.normal(ks[3], (c4,), jnp.float32)
    w3 = weight_norm(0.3 * jax.random.normal(ks[4], (c4, 1, kernel_size), jnp.float32))
    b3 = 0.1 * jax.random.normal(ks[5], (c4,), jnp.float32)
    w4 = weight_norm(0.3 * jax.random.normal(ks[6], (out_channels, c4, 1), jnp.float32))
    b4 = 0.1 * jax.random.normal(ks[7], (out_channels,), jnp.float32)
    # Normalizer params / buffers exactly as in Normalizer.__init__
    s1, be1 = jnp.ones((c4,)), jnp.zeros((c4,))
    ma1, mv1 = jnp.zeros((c4,)), jnp.ones((c4,))
    s2, be2 = jnp.ones((out_channels,)), jnp.zeros((out_channels,))
    ma2, mv2 = jnp.zeros((out_channels,)), jnp.ones((out_channels,))
    return (w1, b1, w2, b2, w3, b3, w4, b4, s1, be1, ma1, mv1, s2, be2, ma2, mv2)


if __name__ == "__main__":
    N, in_channels, out_channels, L = 2, 6, 4, 16
    kernel_size, dilation, down_sampling = 3, 2, 0

    key = jax.random.PRNGKey(0)
    kx, kp = jax.random.split(key)
    x = jax.random.normal(kx, (N, in_channels, L), jnp.float32)
    params = init_params(kp, in_channels, out_channels, kernel_size)

    out = seperable_densenet_unit(x, params, kernel_size=kernel_size,
                                  dilation=dilation, down_sampling=down_sampling)
    out = jax.block_until_ready(out)
    assert out.shape == (N, out_channels + in_channels, L), out.shape

    # Tight check against a reference that rounds the matmul operands to bf16
    # exactly like the kernel's MXU path (f32 accumulation in both).
    ref_bf16 = ref_forward(x, params, kernel_size=kernel_size, dilation=dilation,
                           down_sampling=down_sampling, matmul_dtype=jnp.bfloat16)
    err = float(jnp.max(jnp.abs(out - ref_bf16)))
    assert err < 2e-3, f"kernel/reference mismatch: max abs err = {err}"

    # Informational drift vs the exact f32 module semantics (bf16 MXU operands
    # are a deliberate precision/perf trade-off; not asserted tightly).
    ref_f32 = ref_forward(x, params, kernel_size=kernel_size, dilation=dilation,
                          down_sampling=down_sampling, matmul_dtype=jnp.float32)
    _ = float(jnp.max(jnp.abs(out - ref_f32)))

    print("KERNEL_OK")
</pallas_src>

<mosaic_0001>
module attributes {stable_mosaic.version = 11 : i64} {
  func.func @_dense_unit_kernel(%arg0: i32, %arg1: memref<2x16x6xf32, #tpu.memory_space<vmem>>, %arg2: memref<3x6xf32, #tpu.memory_space<vmem>>, %arg3: memref<6x16xbf16, #tpu.memory_space<vmem>>, %arg4: memref<3x16xf32, #tpu.memory_space<vmem>>, %arg5: memref<16x4xbf16, #tpu.memory_space<vmem>>, %arg6: memref<8x16xf32, #tpu.memory_space<vmem>>, %arg7: memref<32x1xi32, #tpu.memory_space<vmem>>, %arg8: memref<2x16x4xf32, #tpu.memory_space<vmem>>) attributes {dimension_semantics = [#tpu.dimension_semantics<parallel>], iteration_bounds = array<i64: 1>, scalar_prefetch = 0 : i64, scratch_operands = 0 : i64, tpu.core_type = #tpu.core_type<tc>, window_params = [{transform_indices = @transform_0, window_bounds = array<i64: 2, 16, 6>}, {pipeline_mode = #tpu.pipeline_mode<synchronous>, transform_indices = @transform_1, window_bounds = array<i64: 3, 6>}, {pipeline_mode = #tpu.pipeline_mode<synchronous>, transform_indices = @transform_2, window_bounds = array<i64: 6, 16>}, {pipeline_mode = #tpu.pipeline_mode<synchronous>, transform_indices = @transform_3, window_bounds = array<i64: 3, 16>}, {pipeline_mode = #tpu.pipeline_mode<synchronous>, transform_indices = @transform_4, window_bounds = array<i64: 16, 4>}, {pipeline_mode = #tpu.pipeline_mode<synchronous>, transform_indices = @transform_5, window_bounds = array<i64: 8, 16>}, {pipeline_mode = #tpu.pipeline_mode<synchronous>, transform_indices = @transform_6, window_bounds = array<i64: 32, 1>}, {transform_indices = @transform_7, window_bounds = array<i64: 2, 16, 4>}]} {
    %c0 = arith.constant 0 : index
    %c0_0 = arith.constant 0 : index
    %0 = vector.load %arg7[%c0, %c0_0] : memref<32x1xi32, #tpu.memory_space<vmem>>, vector<32x1xi32>
    %c0_1 = arith.constant 0 : index
    %c0_2 = arith.constant 0 : index
    %1 = vector.load %arg6[%c0_1, %c0_2] : memref<8x16xf32, #tpu.memory_space<vmem>>, vector<1x6xf32>
    %2 = vector.shape_cast %1 : vector<1x6xf32> to vector<6xf32>
    %c1 = arith.constant 1 : index
    %c0_3 = arith.constant 0 : index
    %3 = vector.load %arg6[%c1, %c0_3] : memref<8x16xf32, #tpu.memory_space<vmem>>, vector<1x16xf32>
    %4 = vector.shape_cast %3 : vector<1x16xf32> to vector<16xf32>
    %c2 = arith.constant 2 : index
    %c0_4 = arith.constant 0 : index
    %5 = vector.load %arg6[%c2, %c0_4] : memref<8x16xf32, #tpu.memory_space<vmem>>, vector<1x16xf32>
    %6 = vector.shape_cast %5 : vector<1x16xf32> to vector<16xf32>
    %c3 = arith.constant 3 : index
    %c0_5 = arith.constant 0 : index
    %7 = vector.load %arg6[%c3, %c0_5] : memref<8x16xf32, #tpu.memory_space<vmem>>, vector<1x4xf32>
    %8 = vector.shape_cast %7 : vector<1x4xf32> to vector<4xf32>
    %c4 = arith.constant 4 : index
    %c0_6 = arith.constant 0 : index
    %9 = vector.load %arg6[%c4, %c0_6] : memref<8x16xf32, #tpu.memory_space<vmem>>, vector<1x16xf32>
    %10 = vector.shape_cast %9 : vector<1x16xf32> to vector<16xf32>
    %c5 = arith.constant 5 : index
    %c0_7 = arith.constant 0 : index
    %11 = vector.load %arg6[%c5, %c0_7] : memref<8x16xf32, #tpu.memory_space<vmem>>, vector<1x16xf32>
    %12 = vector.shape_cast %11 : vector<1x16xf32> to vector<16xf32>
    %c6 = arith.constant 6 : index
    %c0_8 = arith.constant 0 : index
    %13 = vector.load %arg6[%c6, %c0_8] : memref<8x16xf32, #tpu.memory_space<vmem>>, vector<1x4xf32>
    %14 = vector.shape_cast %13 : vector<1x4xf32> to vector<4xf32>
    %c7 = arith.constant 7 : index
    %c0_9 = arith.constant 0 : index
    %15 = vector.load %arg6[%c7, %c0_9] : memref<8x16xf32, #tpu.memory_space<vmem>>, vector<1x4xf32>
    %16 = vector.shape_cast %15 : vector<1x4xf32> to vector<4xf32>
    %c0_10 = arith.constant 0 : index
    %c0_11 = arith.constant 0 : index
    %c0_12 = arith.constant 0 : index
    %17 = vector.load %arg1[%c0_10, %c0_11, %c0_12] : memref<2x16x6xf32, #tpu.memory_space<vmem>>, vector<2x16x6xf32>
    %18 = vector.shape_cast %17 : vector<2x16x6xf32> to vector<32x6xf32>
    %c2_i32 = arith.constant 2 : i32
    %19 = tpu.dynamic_rotate %18 by %c2_i32 dim 0 : vector<32x6xf32>, i32 -> vector<32x6xf32>
    %c-2_i32 = arith.constant -2 : i32
    %20 = vector.broadcast %c-2_i32 : i32 to vector<32x1xi32>
    %21 = arith.addi %0, %20 : vector<32x1xi32>
    %c0_i32 = arith.constant 0 : i32
    %22 = vector.broadcast %c0_i32 : i32 to vector<32x1xi32>
    %23 = arith.cmpi sge, %21, %22 : vector<32x1xi32>
    %c-2_i32_13 = arith.constant -2 : i32
    %24 = vector.broadcast %c-2_i32_13 : i32 to vector<32x1xi32>
    %25 = arith.addi %0, %24 : vector<32x1xi32>
    %c16_i32 = arith.constant 16 : i32
    %26 = vector.broadcast %c16_i32 : i32 to vector<32x1xi32>
    %27 = arith.cmpi slt, %25, %26 : vector<32x1xi32>
    %28 = arith.andi %23, %27 : vector<32x1xi1>
    %cst = arith.constant 0.000000e+00 : f32
    %29 = vector.shape_cast %28 : vector<32x1xi1> to vector<32x1xi1>
    %30 = vector.broadcast %29 : vector<32x1xi1> to vector<32x6xi1>
    %31 = vector.broadcast %cst : f32 to vector<32x6xf32>
    %32 = arith.select %30, %19, %31 : vector<32x6xi1>, vector<32x6xf32>
    %c0_14 = arith.constant 0 : index
    %c0_15 = arith.constant 0 : index
    %33 = vector.load %arg2[%c0_14, %c0_15] : memref<3x6xf32, #tpu.memory_space<vmem>>, vector<1x6xf32>
    %34 = vector.shape_cast %33 : vector<1x6xf32> to vector<6xf32>
    %35 = vector.shape_cast %34 : vector<6xf32> to vector<1x6xf32>
    %36 = vector.broadcast %35 : vector<1x6xf32> to vector<32x6xf32>
    %37 = arith.mulf %32, %36 : vector<32x6xf32>
    %c1_16 = arith.constant 1 : index
    %c0_17 = arith.constant 0 : index
    %38 = vector.load %arg2[%c1_16, %c0_17] : memref<3x6xf32, #tpu.memory_space<vmem>>, vector<1x6xf32>
    %39 = vector.shape_cast %38 : vector<1x6xf32> to vector<6xf32>
    %40 = vector.shape_cast %39 : vector<6xf32> to vector<1x6xf32>
    %41 = vector.broadcast %40 : vector<1x6xf32> to vector<32x6xf32>
    %42 = arith.mulf %18, %41 : vector<32x6xf32>
    %43 = arith.addf %37, %42 : vector<32x6xf32>
    %c30_i32 = arith.constant 30 : i32
    %44 = tpu.dynamic_rotate %18 by %c30_i32 dim 0 : vector<32x6xf32>, i32 -> vector<32x6xf32>
    %c2_i32_18 = arith.constant 2 : i32
    %45 = vector.broadcast %c2_i32_18 : i32 to vector<32x1xi32>
    %46 = arith.addi %0, %45 : vector<32x1xi32>
    %c0_i32_19 = arith.constant 0 : i32
    %47 = vector.broadcast %c0_i32_19 : i32 to vector<32x1xi32>
    %48 = arith.cmpi sge, %46, %47 : vector<32x1xi32>
    %c2_i32_20 = arith.constant 2 : i32
    %49 = vector.broadcast %c2_i32_20 : i32 to vector<32x1xi32>
    %50 = arith.addi %0, %49 : vector<32x1xi32>
    %c16_i32_21 = arith.constant 16 : i32
    %51 = vector.broadcast %c16_i32_21 : i32 to vector<32x1xi32>
    %52 = arith.cmpi slt, %50, %51 : vector<32x1xi32>
    %53 = arith.andi %48, %52 : vector<32x1xi1>
    %cst_22 = arith.constant 0.000000e+00 : f32
    %54 = vector.shape_cast %53 : vector<32x1xi1> to vector<32x1xi1>
    %55 = vector.broadcast %54 : vector<32x1xi1> to vector<32x6xi1>
    %56 = vector.broadcast %cst_22 : f32 to vector<32x6xf32>
    %57 = arith.select %55, %44, %56 : vector<32x6xi1>, vector<32x6xf32>
    %c2_23 = arith.constant 2 : index
    %c0_24 = arith.constant 0 : index
    %58 = vector.load %arg2[%c2_23, %c0_24] : memref<3x6xf32, #tpu.memory_space<vmem>>, vector<1x6xf32>
    %59 = vector.shape_cast %58 : vector<1x6xf32> to vector<6xf32>
    %60 = vector.shape_cast %59 : vector<6xf32> to vector<1x6xf32>
    %61 = vector.broadcast %60 : vector<1x6xf32> to vector<32x6xf32>
    %62 = arith.mulf %57, %61 : vector<32x6xf32>
    %63 = arith.addf %43, %62 : vector<32x6xf32>
    %64 = vector.shape_cast %2 : vector<6xf32> to vector<1x6xf32>
    %65 = vector.broadcast %64 : vector<1x6xf32> to vector<32x6xf32>
    %66 = arith.addf %63, %65 : vector<32x6xf32>
    %67 = arith.truncf %66 : vector<32x6xf32> to vector<32x6xbf16>
    %c0_25 = arith.constant 0 : index
    %c0_26 = arith.constant 0 : index
    %68 = vector.load %arg3[%c0_25, %c0_26] : memref<6x16xbf16, #tpu.memory_space<vmem>>, vector<6x16xbf16>
    %cst_27 = arith.constant dense<0.000000e+00> : vector<32x16xf32>
    %69 = tpu.matmul %67, %68, %cst_27 {dimension_numbers = #tpu.dot_dimension_numbers<[1], [0], [0], [1], [0, 0, 1, 1], [], []>} : vector<32x6xbf16>, vector<6x16xbf16>, vector<32x16xf32> -> vector<32x16xf32>
    %70 = vector.shape_cast %4 : vector<16xf32> to vector<1x16xf32>
    %71 = vector.broadcast %70 : vector<1x16xf32> to vector<32x16xf32>
    %72 = arith.addf %69, %71 : vector<32x16xf32>
    %cst_28 = arith.constant dense<0.000000e+00> : vector<32xf32>
    %73 = vector.multi_reduction <add>, %72, %cst_28 [1] : vector<32x16xf32> to vector<32xf32>
    %74 = vector.shape_cast %73 : vector<32xf32> to vector<32x1xf32>
    %cst_29 = arith.constant 1.600000e+01 : f32
    %75 = vector.broadcast %cst_29 : f32 to vector<32x1xf32>
    %76 = arith.divf %74, %75 : vector<32x1xf32>
    %77 = vector.broadcast %76 : vector<32x1xf32> to vector<32x16xf32>
    %78 = arith.subf %72, %77 : vector<32x16xf32>
    %79 = arith.mulf %78, %78 : vector<32x16xf32>
    %cst_30 = arith.constant dense<0.000000e+00> : vector<32xf32>
    %80 = vector.multi_reduction <add>, %79, %cst_30 [1] : vector<32x16xf32> to vector<32xf32>
    %81 = vector.shape_cast %80 : vector<32xf32> to vector<32x1xf32>
    %cst_31 = arith.constant 1.500000e+01 : f32
    %82 = vector.broadcast %cst_31 : f32 to vector<32x1xf32>
    %83 = arith.divf %81, %82 : vector<32x1xf32>
    %84 = math.sqrt %83 : vector<32x1xf32>
    %cst_32 = arith.constant 9.99999974E-6 : f32
    %85 = vector.broadcast %cst_32 : f32 to vector<32x1xf32>
    %86 = arith.addf %84, %85 : vector<32x1xf32>
    %cst_33 = arith.constant 1.000000e+00 : f32
    %87 = vector.broadcast %cst_33 : f32 to vector<32x1xf32>
    %88 = arith.divf %87, %86 : vector<32x1xf32>
    %89 = vector.broadcast %88 : vector<32x1xf32> to vector<32x16xf32>
    %90 = arith.mulf %78, %89 : vector<32x16xf32>
    %91 = vector.shape_cast %10 : vector<16xf32> to vector<1x16xf32>
    %92 = vector.broadcast %91 : vector<1x16xf32> to vector<32x16xf32>
    %93 = arith.mulf %90, %92 : vector<32x16xf32>
    %94 = vector.shape_cast %12 : vector<16xf32> to vector<1x16xf32>
    %95 = vector.broadcast %94 : vector<1x16xf32> to vector<32x16xf32>
    %96 = arith.addf %93, %95 : vector<32x16xf32>
    %cst_34 = arith.constant 0.000000e+00 : f32
    %97 = vector.broadcast %cst_34 : f32 to vector<32x16xf32>
    %98 = arith.cmpf ogt, %96, %97 : vector<32x16xf32>
    %99 = math.exp %96 : vector<32x16xf32>
    %cst_35 = arith.constant 1.000000e+00 : f32
    %100 = vector.broadcast %cst_35 : f32 to vector<32x16xf32>
    %101 = arith.subf %99, %100 : vector<32x16xf32>
    %cst_36 = arith.constant 1.67326319 : f32
    %102 = vector.broadcast %cst_36 : f32 to vector<32x16xf32>
    %103 = arith.mulf %102, %101 : vector<32x16xf32>
    %104 = arith.select %98, %96, %103 : vector<32x16xi1>, vector<32x16xf32>
    %cst_37 = arith.constant 1.05070102 : f32
    %105 = vector.broadcast %cst_37 : f32 to vector<32x16xf32>
    %106 = arith.mulf %105, %104 : vector<32x16xf32>
    %c2_i32_38 = arith.constant 2 : i32
    %107 = tpu.dynamic_rotate %106 by %c2_i32_38 dim 0 : vector<32x16xf32>, i32 -> vector<32x16xf32>
    %c-2_i32_39 = arith.constant -2 : i32
    %108 = vector.broadcast %c-2_i32_39 : i32 to vector<32x1xi32>
    %109 = arith.addi %0, %108 : vector<32x1xi32>
    %c0_i32_40 = arith.constant 0 : i32
    %110 = vector.broadcast %c0_i32_40 : i32 to vector<32x1xi32>
    %111 = arith.cmpi sge, %109, %110 : vector<32x1xi32>
    %c-2_i32_41 = arith.constant -2 : i32
    %112 = vector.broadcast %c-2_i32_41 : i32 to vector<32x1xi32>
    %113 = arith.addi %0, %112 : vector<32x1xi32>
    %c16_i32_42 = arith.constant 16 : i32
    %114 = vector.broadcast %c16_i32_42 : i32 to vector<32x1xi32>
    %115 = arith.cmpi slt, %113, %114 : vector<32x1xi32>
    %116 = arith.andi %111, %115 : vector<32x1xi1>
    %cst_43 = arith.constant 0.000000e+00 : f32
    %117 = vector.shape_cast %116 : vector<32x1xi1> to vector<32x1xi1>
    %118 = vector.broadcast %117 : vector<32x1xi1> to vector<32x16xi1>
    %119 = vector.broadcast %cst_43 : f32 to vector<32x16xf32>
    %120 = arith.select %118, %107, %119 : vector<32x16xi1>, vector<32x16xf32>
    %c0_44 = arith.constant 0 : index
    %c0_45 = arith.constant 0 : index
    %121 = vector.load %arg4[%c0_44, %c0_45] : memref<3x16xf32, #tpu.memory_space<vmem>>, vector<1x16xf32>
    %122 = vector.shape_cast %121 : vector<1x16xf32> to vector<16xf32>
    %123 = vector.shape_cast %122 : vector<16xf32> to vector<1x16xf32>
    %124 = vector.broadcast %123 : vector<1x16xf32> to vector<32x16xf32>
    %125 = arith.mulf %120, %124 : vector<32x16xf32>
    %c1_46 = arith.constant 1 : index
    %c0_47 = arith.constant 0 : index
    %126 = vector.load %arg4[%c1_46, %c0_47] : memref<3x16xf32, #tpu.memory_space<vmem>>, vector<1x16xf32>
    %127 = vector.shape_cast %126 : vector<1x16xf32> to vector<16xf32>
    %128 = vector.shape_cast %127 : vector<16xf32> to vector<1x16xf32>
    %129 = vector.broadcast %128 : vector<1x16xf32> to vector<32x16xf32>
    %130 = arith.mulf %106, %129 : vector<32x16xf32>
    %131 = arith.addf %125, %130 : vector<32x16xf32>
    %c30_i32_48 = arith.constant 30 : i32
    %132 = tpu.dynamic_rotate %106 by %c30_i32_48 dim 0 : vector<32x16xf32>, i32 -> vector<32x16xf32>
    %c2_i32_49 = arith.constant 2 : i32
    %133 = vector.broadcast %c2_i32_49 : i32 to vector<32x1xi32>
    %134 = arith.addi %0, %133 : vector<32x1xi32>
    %c0_i32_50 = arith.constant 0 : i32
    %135 = vector.broadcast %c0_i32_50 : i32 to vector<32x1xi32>
    %136 = arith.cmpi sge, %134, %135 : vector<32x1xi32>
    %c2_i32_51 = arith.constant 2 : i32
    %137 = vector.broadcast %c2_i32_51 : i32 to vector<32x1xi32>
    %138 = arith.addi %0, %137 : vector<32x1xi32>
    %c16_i32_52 = arith.constant 16 : i32
    %139 = vector.broadcast %c16_i32_52 : i32 to vector<32x1xi32>
    %140 = arith.cmpi slt, %138, %139 : vector<32x1xi32>
    %141 = arith.andi %136, %140 : vector<32x1xi1>
    %cst_53 = arith.constant 0.000000e+00 : f32
    %142 = vector.shape_cast %141 : vector<32x1xi1> to vector<32x1xi1>
    %143 = vector.broadcast %142 : vector<32x1xi1> to vector<32x16xi1>
    %144 = vector.broadcast %cst_53 : f32 to vector<32x16xf32>
    %145 = arith.select %143, %132, %144 : vector<32x16xi1>, vector<32x16xf32>
    %c2_54 = arith.constant 2 : index
    %c0_55 = arith.constant 0 : index
    %146 = vector.load %arg4[%c2_54, %c0_55] : memref<3x16xf32, #tpu.memory_space<vmem>>, vector<1x16xf32>
    %147 = vector.shape_cast %146 : vector<1x16xf32> to vector<16xf32>
    %148 = vector.shape_cast %147 : vector<16xf32> to vector<1x16xf32>
    %149 = vector.broadcast %148 : vector<1x16xf32> to vector<32x16xf32>
    %150 = arith.mulf %145, %149 : vector<32x16xf32>
    %151 = arith.addf %131, %150 : vector<32x16xf32>
    %152 = vector.shape_cast %6 : vector<16xf32> to vector<1x16xf32>
    %153 = vector.broadcast %152 : vector<1x16xf32> to vector<32x16xf32>
    %154 = arith.addf %151, %153 : vector<32x16xf32>
    %155 = arith.truncf %154 : vector<32x16xf32> to vector<32x16xbf16>
    %c0_56 = arith.constant 0 : index
    %c0_57 = arith.constant 0 : index
    %156 = vector.load %arg5[%c0_56, %c0_57] : memref<16x4xbf16, #tpu.memory_space<vmem>>, vector<16x4xbf16>
    %cst_58 = arith.constant dense<0.000000e+00> : vector<32x4xf32>
    %157 = tpu.matmul %155, %156, %cst_58 {dimension_numbers = #tpu.dot_dimension_numbers<[1], [0], [0], [1], [0, 0, 1, 1], [], []>} : vector<32x16xbf16>, vector<16x4xbf16>, vector<32x4xf32> -> vector<32x4xf32>
    %158 = vector.shape_cast %8 : vector<4xf32> to vector<1x4xf32>
    %159 = vector.broadcast %158 : vector<1x4xf32> to vector<32x4xf32>
    %160 = arith.addf %157, %159 : vector<32x4xf32>
    %cst_59 = arith.constant dense<0.000000e+00> : vector<32xf32>
    %161 = vector.multi_reduction <add>, %160, %cst_59 [1] : vector<32x4xf32> to vector<32xf32>
    %162 = vector.shape_cast %161 : vector<32xf32> to vector<32x1xf32>
    %cst_60 = arith.constant 4.000000e+00 : f32
    %163 = vector.broadcast %cst_60 : f32 to vector<32x1xf32>
    %164 = arith.divf %162, %163 : vector<32x1xf32>
    %165 = vector.broadcast %164 : vector<32x1xf32> to vector<32x4xf32>
    %166 = arith.subf %160, %165 : vector<32x4xf32>
    %167 = arith.mulf %166, %166 : vector<32x4xf32>
    %cst_61 = arith.constant dense<0.000000e+00> : vector<32xf32>
    %168 = vector.multi_reduction <add>, %167, %cst_61 [1] : vector<32x4xf32> to vector<32xf32>
    %169 = vector.shape_cast %168 : vector<32xf32> to vector<32x1xf32>
    %cst_62 = arith.constant 3.000000e+00 : f32
    %170 = vector.broadcast %cst_62 : f32 to vector<32x1xf32>
    %171 = arith.divf %169, %170 : vector<32x1xf32>
    %172 = math.sqrt %171 : vector<32x1xf32>
    %cst_63 = arith.constant 9.99999974E-6 : f32
    %173 = vector.broadcast %cst_63 : f32 to vector<32x1xf32>
    %174 = arith.addf %172, %173 : vector<32x1xf32>
    %cst_64 = arith.constant 1.000000e+00 : f32
    %175 = vector.broadcast %cst_64 : f32 to vector<32x1xf32>
    %176 = arith.divf %175, %174 : vector<32x1xf32>
    %177 = vector.broadcast %176 : vector<32x1xf32> to vector<32x4xf32>
    %178 = arith.mulf %166, %177 : vector<32x4xf32>
    %179 = vector.shape_cast %14 : vector<4xf32> to vector<1x4xf32>
    %180 = vector.broadcast %179 : vector<1x4xf32> to vector<32x4xf32>
    %181 = arith.mulf %178, %180 : vector<32x4xf32>
    %182 = vector.shape_cast %16 : vector<4xf32> to vector<1x4xf32>
    %183 = vector.broadcast %182 : vector<1x4xf32> to vector<32x4xf32>
    %184 = arith.addf %181, %183 : vector<32x4xf32>
    %cst_65 = arith.constant 0.000000e+00 : f32
    %185 = vector.broadcast %cst_65 : f32 to vector<32x4xf32>
    %186 = arith.cmpf ogt, %184, %185 : vector<32x4xf32>
    %187 = math.exp %184 : vector<32x4xf32>
    %cst_66 = arith.constant 1.000000e+00 : f32
    %188 = vector.broadcast %cst_66 : f32 to vector<32x4xf32>
    %189 = arith.subf %187, %188 : vector<32x4xf32>
    %cst_67 = arith.constant 1.67326319 : f32
    %190 = vector.broadcast %cst_67 : f32 to vector<32x4xf32>
    %191 = arith.mulf %190, %189 : vector<32x4xf32>
    %192 = arith.select %186, %184, %191 : vector<32x4xi1>, vector<32x4xf32>
    %cst_68 = arith.constant 1.05070102 : f32
    %193 = vector.broadcast %cst_68 : f32 to vector<32x4xf32>
    %194 = arith.mulf %193, %192 : vector<32x4xf32>
    %195 = vector.shape_cast %194 : vector<32x4xf32> to vector<2x16x4xf32>
    %c0_69 = arith.constant 0 : index
    %c0_70 = arith.constant 0 : index
    %c0_71 = arith.constant 0 : index
    %196 = vector.load %arg8[%c0_69, %c0_70, %c0_71] : memref<2x16x4xf32, #tpu.memory_space<vmem>>, vector<2x16x4xf32>
    tpu.vector_store %arg8[%c0_69, %c0_70, %c0_71], %195 {strides = array<i32>} : memref<2x16x4xf32, #tpu.memory_space<vmem>>, vector<2x16x4xf32>,
    return
  }
  func.func @transform_0(%arg0: i32) -> (i32, i32, i32) {
    %c0_i32 = arith.constant 0 : i32
    %c0_i32_0 = arith.constant 0 : i32
    %c0_i32_1 = arith.constant 0 : i32
    return %arg0, %c0_i32, %c0_i32_0 : i32, i32, i32
  }
  func.func @transform_1(%arg0: i32) -> (i32, i32) {
    %c0_i32 = arith.constant 0 : i32
    %c0_i32_0 = arith.constant 0 : i32
    %c0_i32_1 = arith.constant 0 : i32
    return %c0_i32, %c0_i32_0 : i32, i32
  }
  func.func @transform_2(%arg0: i32) -> (i32, i32) {
    %c0_i32 = arith.constant 0 : i32
    %c0_i32_0 = arith.constant 0 : i32
    %c0_i32_1 = arith.constant 0 : i32
    return %c0_i32, %c0_i32_0 : i32, i32
  }
  func.func @transform_3(%arg0: i32) -> (i32, i32) {
    %c0_i32 = arith.constant 0 : i32
    %c0_i32_0 = arith.constant 0 : i32
    %c0_i32_1 = arith.constant 0 : i32
    return %c0_i32, %c0_i32_0 : i32, i32
  }
  func.func @transform_4(%arg0: i32) -> (i32, i32) {
    %c0_i32 = arith.constant 0 : i32
    %c0_i32_0 = arith.constant 0 : i32
    %c0_i32_1 = arith.constant 0 : i32
    return %c0_i32, %c0_i32_0 : i32, i32
  }
  func.func @transform_5(%arg0: i32) -> (i32, i32) {
    %c0_i32 = arith.constant 0 : i32
    %c0_i32_0 = arith.constant 0 : i32
    %c0_i32_1 = arith.constant 0 : i32
    return %c0_i32, %c0_i32_0 : i32, i32
  }
  func.func @transform_6(%arg0: i32) -> (i32, i32) {
    %c0_i32 = arith.constant 0 : i32
    %c0_i32_0 = arith.constant 0 : i32
    %c0_i32_1 = arith.constant 0 : i32
    return %c0_i32, %c0_i32_0 : i32, i32
  }
  func.func @transform_7(%arg0: i32) -> (i32, i32, i32) {
    %c0_i32 = arith.constant 0 : i32
    %c0_i32_0 = arith.constant 0 : i32
    %c0_i32_1 = arith.constant 0 : i32
    return %arg0, %c0_i32, %c0_i32_0 : i32, i32, i32
  }
}

</mosaic_0001>

<bundles_post_ra>
// kernel: tpu_custom_call.1
= control target key start
LH: loop header
LB: loop body
LE: loop exit
PB: predicated region body
PF: predicated region fallthrough
CT: control target
= control target key end

     0   :  { %v757_v0 = vmov 0   ;;  %v47_v23 = vlaneseq  ;;  %s1037_s6 = inlined_call_operand.vmem [shape: s32[32,1], index: 6, kind: input, shape index: {}]   ;;  %s1038_s2 = inlined_call_operand.vmem [shape: bf16[6,16], index: 2, kind: input, shape index: {}]   ;;  %s1039_s0 = inlined_call_operand.vmem [shape: f32[2,16,6], index: 0, kind: input, shape index: {}]   ;;  %s1040_s1 = inlined_call_operand.vmem [shape: f32[3,6], index: 1, kind: input, shape index: {}]   ;;  %s1041_s5 = inlined_call_operand.vmem [shape: f32[8,16], index: 5, kind: input, shape index: {}]   ;;  %s1042_s4 = inlined_call_operand.vmem [shape: bf16[16,4], index: 4, kind: input, shape index: {}]   ;;  %s1043_s3 = inlined_call_operand.vmem [shape: f32[3,16], index: 3, kind: input, shape index: {}]   ;;  %s1044_s7 = inlined_call_operand.vmem [shape: f32[2,16,4], index: 7, kind: output, shape index: {}]  }
   0x1   :  { %707 = vset.pattern.permute.xlu1 %v757_v0  ;;  %706 = vset.pattern.permute.xlu0 %v757_v0  ;;  %v29_v1 = vld [vmem:[%s1037_s6 + $0x10] sm:$0xff]  ;;  %v27_v2 = vld [vmem:[%s1037_s6] sm:$0xff]  ;;  %v30_v3 = vld [vmem:[%s1037_s6 + $0x18] sm:$0xff] }
   0x2   :  { %v56_v4 = vadd.s32 4294967294, %v29_v1  ;;  %v54_v5 = vadd.s32 4294967294, %v27_v2  ;;  %v57_v6 = vadd.s32 4294967294, %v30_v3  ;;  %v28_v7 = vld [vmem:[%s1037_s6 + $0x8] sm:$0xff]  ;;  %v125_v10 = vadd.s32 2, %v27_v2  ;;  %v39_v25 = vld [vmem:[%s1039_s0] sm:$0xff] }
   0x3   :  { %v55_v8 = vadd.s32 4294967294, %v28_v7  ;;  %v126_v9 = vadd.s32 2, %v28_v7  ;;  %v128_v12 = vadd.s32 2, %v30_v3  ;;  %v127_v14 = vadd.s32 2, %v29_v1  ;;  %v188_v21 = vld [vmem:[%s1038_s2] sm:$0x7] }
   0x4   :  { %vm60_vm0 = vcmp.ge.s32.totalorder %v56_v4, 0  ;;  %vm64_vm1 = vcmp.lt.s32.totalorder %v56_v4, 16  ;;  %vm58_vm2 = vcmp.ge.s32.totalorder %v54_v5, 0  ;;  %vm62_vm3 = vcmp.lt.s32.totalorder %v54_v5, 16  ;;  %v42_v26 = vld [vmem:[%s1039_s0 + $0x18] sm:$0xff]  ;;  %v40_v29 = vld [vmem:[%s1039_s0 + $0x8] sm:$0xff] }
   0x5   :  { %vm68_vm4 = vmand %vm60_vm0, %vm64_vm1  ;;  %vm61_vm5 = vcmp.ge.s32.totalorder %v57_v6, 0  ;;  %vm65_vm6 = vcmp.lt.s32.totalorder %v57_v6, 16  ;;  %vm59_vm7 = vcmp.ge.s32.totalorder %v55_v8, 0  ;;  %vm63_vm8 = vcmp.lt.s32.totalorder %v55_v8, 16  ;;  %v41_v30 = vld [vmem:[%s1039_s0 + $0x10] sm:$0xff] }
   0x6   :  { %v72_v11 = vsel %vm68_vm4, 1, %v757_v0  ;;  %vm66_vm9 = vmand %vm58_vm2, %vm62_vm3  ;;  %vm130_vm10 = vcmp.ge.s32.totalorder %v126_v9, 0  ;;  %vm134_vm11 = vcmp.lt.s32.totalorder %v126_v9, 16  ;;  %vm129_vm13 = vcmp.ge.s32.totalorder %v125_v10, 0  ;;  %v660_v38 = vld [vmem:[%s1040_s1 + $0x1] ss:$0 sm:$0xff] }
   0x7   :  { %81 = vperm.xlu1 %707, %v72_v11   ;;  %v70_v13 = vsel %vm66_vm9, 1, %v757_v0  ;;  %vm69_vm12 = vmand %vm61_vm5, %vm65_vm6  ;;  %vm133_vm14 = vcmp.lt.s32.totalorder %v125_v10, 16  ;;  %vm132_vm4 = vcmp.ge.s32.totalorder %v128_v12, 0  ;;  %vm136_vm2 = vcmp.lt.s32.totalorder %v128_v12, 16  ;;  %v659_v42 = vld [vmem:[%s1040_s1] ss:$0 sm:$0xff] }
   0x8   :  { %75 = vperm.xlu0 %706, %v70_v13   ;;  %v73_v15 = vsel %vm69_vm12, 1, %v757_v0  ;;  %vm67_vm15 = vmand %vm59_vm7, %vm63_vm8  ;;  %vm131_vm3 = vcmp.ge.s32.totalorder %v127_v14, 0  ;;  %vm135_vm9 = vcmp.lt.s32.totalorder %v127_v14, 16  ;;  %vm200_vm7 = vcmask 1042432   ;;  %v661_v56 = vld [vmem:[%s1040_s1 + $0x2] ss:$0 sm:$0xff] }
   0x9   :  { %v71_v16 = vsel %vm67_vm15, 1, %v757_v0  ;;  %vm138_vm0 = vmand %vm130_vm10, %vm134_vm11  ;;  %704 = vmatprep.subr.msk.bf16.mxu0 %vm200_vm7, %v188_v21  ;;  %v202_v22 = vsel %vm200_vm7, %v188_v21, 0  ;;  %v814_v24 = vshrl.u32 %v47_v23, 7  ;;  %v43_v27 = vrot.slane %v39_v25, 6  ;;  %v662_v8 = vld [vmem:[%s1041_s5] ss:$0 sm:$0xff] }
   0xa   :  { %vm137_vm1 = vmand %vm129_vm13, %vm133_vm14  ;;  %v142_v17 = vsel %vm138_vm0, 1, %v757_v0  ;;  %693 = vmatpush3.bf16.msra.mxu0 %v202_v22  ;;  %v46_v28 = vrot.slane %v42_v26, 6  ;;  %v44_v33 = vrot.slane %v40_v29, 6  ;;  %v45_v34 = vrot.slane %v41_v30, 6 }
   0xb   :  { %84 = vperm.xlu1 %707, %v73_v15   ;;  %v141_v18 = vsel %vm137_vm1, 1, %v757_v0  ;;  %vm140_vm5 = vmand %vm132_vm4, %vm136_vm2  ;;  %vm49_vm8 = vcmp.lt.s32.totalorder %v814_v24, 2  ;;  %v117_v36 = vrot.slane %v40_v29, 2  ;;  %v118_v37 = vrot.slane %v41_v30, 2 }
   0xc   :  { %78 = vperm.xlu0 %706, %v71_v16   ;;  %vm139_vm6 = vmand %vm131_vm3, %vm135_vm9  ;;  %v144_v19 = vsel %vm140_vm5, 1, %v757_v0  ;;  %v53_v35 = vsel %vm49_vm8, %v46_v28, %v43_v27  ;;  %v52_v40 = vsel %vm49_vm8, %v43_v27, %v44_v33  ;;  %vm120_vm11 = vcmp.lt.s32.totalorder %v814_v24, 6 }
   0xd   :  { %v143_v20 = vsel %vm139_vm6, 1, %v757_v0  ;;  %v116_v41 = vrot.slane %v39_v25, 2  ;;  %v50_v44 = vsel %vm49_vm8, %v45_v34, %v46_v28  ;;  %v51_v46 = vsel %vm49_vm8, %v44_v33, %v45_v34 }
   0xe   :  { %v119_v47 = vrot.slane %v42_v26, 2  ;;  %v108_v48 = vmul.f32 %v660_v38, %v39_v25  ;;  %v109_v50 = vmul.f32 %v660_v38, %v40_v29  ;;  %v122_v51 = vsel %vm120_vm11, %v117_v36, %v118_v37  ;;  %v663_v29 = vld [vmem:[%s1041_s5 + $0x1] ss:$0 sm:$0xff] }
   0xf   :  { %149 = vperm.xlu1 %707, %v142_v17   ;;  %v123_v57 = vsel %vm120_vm11, %v116_v41, %v117_v36  ;;  %v110_v59 = vmul.f32 %v660_v38, %v41_v30  ;;  %v111_v61 = vmul.f32 %v660_v38, %v42_v26  ;;  %vm193_vm2 = vcmask 48128  }
  0x10   :  { %146 = vperm.xlu0 %706, %v141_v18   ;;  %v124_v63 = vsel %vm120_vm11, %v119_v47, %v116_v41  ;;  %v121_v9 = vsel %vm120_vm11, %v118_v37, %v119_v47  ;;  %vm1045_vm3 = vcmask 130048  }
  0x13   :  { %155 = vperm.xlu1 %707, %v144_v19  }
  0x14   :  { %152 = vperm.xlu0 %706, %v143_v20  }
  0x82   :  { %v829_v31 = vpop.permute.xlu1 %81 }
  0x83   :  { %v831_v32 = vpop.permute.xlu0 %75  ;;  %vm88_vm13 = vcmp.eq.s32.totalorder %v829_v31, 1 }
  0x84   :  { %vm86_vm10 = vcmp.eq.s32.totalorder %v831_v32, 1  ;;  %v92_v58 = vsel %vm88_vm13, %v51_v46, 0.0 }
  0x85   :  { %v90_v43 = vsel %vm86_vm10, %v53_v35, 0.0  ;;  %v101_v4 = vmul.f32 %v659_v42, %v92_v58 }
  0x86   :  { %v839_v39 = vpop.permute.xlu1 %84  ;;  %v99_v52 = vmul.f32 %v659_v42, %v90_v43 }
  0x87   :  { %vm89_vm12 = vcmp.eq.s32.totalorder %v839_v39, 1  ;;  %v852_v45 = vpop.permute.xlu0 %78  ;;  %v114_v18 = vadd.f32 %v110_v59, %v101_v4 }
  0x88   :  { %vm87_vm14 = vcmp.eq.s32.totalorder %v852_v45, 1  ;;  %v93_v53 = vsel %vm89_vm12, %v50_v44, 0.0  ;;  %v112_v5 = vadd.f32 %v108_v48, %v99_v52 }
  0x89   :  { %v91_v49 = vsel %vm87_vm14, %v52_v40, 0.0  ;;  %v102_v0 = vmul.f32 %v659_v42, %v93_v53 }
  0x8a   :  { %v100_v54 = vmul.f32 %v659_v42, %v91_v49  ;;  %v864_v55 = vpop.permute.xlu1 %149 }
  0x8b   :  { %vm158_vm15 = vcmp.eq.s32.totalorder %v864_v55, 1  ;;  %v874_v60 = vpop.permute.xlu0 %146  ;;  %v115_v14 = vadd.f32 %v111_v61, %v102_v0 }
  0x8c   :  { %v162_v62 = vsel %vm158_vm15, %v122_v51, 0.0  ;;  %vm157_vm0 = vcmp.eq.s32.totalorder %v874_v60, 1  ;;  %v113_v1 = vadd.f32 %v109_v50, %v100_v54 }
  0x8d   :  { %v171_v2 = vmul.f32 %v661_v56, %v162_v62  ;;  %v161_v3 = vsel %vm157_vm0, %v123_v57, 0.0 }
  0x8e   :  { %v170_v6 = vmul.f32 %v661_v56, %v161_v3  ;;  %v883_v7 = vpop.permute.xlu1 %155  ;;  %v708_v3 = vld [vmem:[%s1042_s4] sm:$0xff]  }
  0x8f   :  { %v175_v10 = vadd.f32 %v171_v2, %v113_v1  ;;  %vm160_vm1 = vcmp.eq.s32.totalorder %v883_v7, 1  ;;  %v891_v11 = vpop.permute.xlu0 %152  ;;  %698 = vmatprep.subr.bf16.mxu1 %v708_v3 }
  0x90   :  { %v174_v12 = vadd.f32 %v170_v6, %v112_v5  ;;  %v164_v13 = vsel %vm160_vm1, %v124_v63, 0.0  ;;  %vm159_vm4 = vcmp.eq.s32.totalorder %v891_v11, 1  ;;  %699 = vmatpush3.bf16.msra.mxu1 %v708_v3  ;;  %v676_v11 = vld [vmem:[%s1041_s5 + $0x3] ss:$0 sm:$0xff] }
  0x91   :  { %v173_v15 = vmul.f32 %v661_v56, %v164_v13  ;;  %v163_v16 = vsel %vm159_vm4, %v121_v9, 0.0  ;;  %v183_v17 = vadd.f32 %v662_v8, %v175_v10 }
  0x92   :  { %v172_v19 = vmul.f32 %v661_v56, %v163_v16  ;;  %v182_v20 = vadd.f32 %v662_v8, %v174_v12 }
  0x93   :  { %v177_v21 = vadd.f32 %v173_v15, %v115_v14 }
  0x94   :  { %v176_v22 = vadd.f32 %v172_v19, %v114_v18  ;;  %v186_v23 = vpack.c.bf16 %v183_v17, %v182_v20 }
  0x95   :  { %v185_v25 = vadd.f32 %v662_v8, %v177_v21 }
  0x96   :  { %v184_v26 = vadd.f32 %v662_v8, %v176_v22  ;;  %694 = vmatprep.mubr.msk.bf16.mxu0 %vm193_vm2, %v186_v23 }
  0x98   :  { %v187_v27 = vpack.c.bf16 %v185_v25, %v184_v26 }
  0x9a   :  { %695 = vmatmul.mubr.msk.bf16.vlgmr.msra.gmra.mxu0 %vm193_vm2, %v187_v27 }
 0x15a   :  { %v696_v28 = vpop.f32.mrf.mxu0 }
 0x15b   :  { %v247_v40 = vadd.f32 %v696_v28, %v663_v29 }
 0x15c   :  { %v238_v30 = vpop.f32.mrf.mxu0 }
 0x15d   :  { %v239_v33 = vadd.f32 %v663_v29, %v238_v30  ;;  %v260_v43 = vsel %vm1045_vm3, %v247_v40, 0.0 }
 0x15e   :  { %v697_v34 = vpop.f32.mrf.mxu0 }
 0x15f   :  { %v250_v35 = vadd.f32 %v697_v34, %v663_v29  ;;  %v254_v36 = vsel %vm1045_vm3, %v239_v33, 0.0 }
 0x160   :  { %v241_v37 = vpop.f32.mrf.mxu0  ;;  %255 = vadd.xlane.f32.xlu0 %v254_v36 }
 0x161   :  { %v242_v38 = vadd.f32 %v663_v29, %v241_v37  ;;  %v263_v42 = vsel %vm1045_vm3, %v250_v35, 0.0 }
 0x163   :  { %v257_v41 = vsel %vm1045_vm3, %v242_v38, 0.0 }
 0x164   :  { %258 = vadd.xlane.f32.xlu1 %v257_v41  ;;  %264 = vadd.xlane.f32.xlu0 %v263_v42 }
 0x168   :  { %261 = vadd.xlane.f32.xlu0 %v260_v43  ;;  %v666_v43 = vld [vmem:[%s1041_s5 + $0x4] ss:$0 sm:$0xff] }
 0x1e9   :  { %v256_v44 = vpop.xlane.xlu0 %255 }
 0x1ea   :  { %v267_v46 = vmul.f32 0.0625, %v256_v44 }
 0x1ec   :  { %v905_v47 = vsub.f32 %v239_v33, %v267_v46  ;;  %v667_v46 = vld [vmem:[%s1041_s5 + $0x5] ss:$0 sm:$0xff] }
 0x1ed   :  { %v259_v48 = vpop.xlane.xlu1 %258  ;;  %v265_v49 = vpop.xlane.xlu0 %264 }
 0x1ee   :  { %v268_v50 = vmul.f32 0.0625, %v259_v48  ;;  %v270_v51 = vmul.f32 0.0625, %v265_v49  ;;  %v275_v52 = vmul.f32 %v905_v47, %v905_v47 }
 0x1f0   :  { %v909_v53 = vsub.f32 %v242_v38, %v268_v50  ;;  %v911_v54 = vsub.f32 %v250_v35, %v270_v51  ;;  %v279_v56 = vsel %vm1045_vm3, %v275_v52, 0.0 }
 0x1f1   :  { %280 = vadd.xlane.f32.xlu1 %v279_v56  ;;  %v262_v57 = vpop.xlane.xlu0 %261 }
 0x1f2   :  { %v269_v58 = vmul.f32 0.0625, %v262_v57  ;;  %v276_v59 = vmul.f32 %v909_v53, %v909_v53  ;;  %v278_v61 = vmul.f32 %v911_v54, %v911_v54 }
 0x1f4   :  { %v918_v62 = vsub.f32 %v247_v40, %v269_v58  ;;  %v282_v63 = vsel %vm1045_vm3, %v276_v59, 0.0  ;;  %v288_v0 = vsel %vm1045_vm3, %v278_v61, 0.0 }
 0x1f5   :  { %283 = vadd.xlane.f32.xlu0 %v282_v63  ;;  %289 = vadd.xlane.f32.xlu1 %v288_v0 }
 0x1f6   :  { %v277_v1 = vmul.f32 %v918_v62, %v918_v62 }
 0x1f8   :  { %v285_v2 = vsel %vm1045_vm3, %v277_v1, 0.0 }
 0x1f9   :  { %286 = vadd.xlane.f32.xlu0 %v285_v2 }
 0x27a   :  { %v281_v4 = vpop.xlane.xlu1 %280 }
 0x27b   :  { %v292_v5 = vmul.f32 0.06666667, %v281_v4 }
 0x27d   :  { %709 = vrsqrt.f32 %v292_v5  ;;  %vm298_vm9 = vcmp.eq.f32.partialorder %v292_v5, inf  ;;  %v301_v16 = vand.u32 2147483648, %v292_v5  ;;  %vm300_vm5 = vcmp.eq.f32.partialorder %v292_v5, 0.0 }
 0x27e   :  { %v290_v6 = vpop.xlane.xlu1 %289  ;;  %v284_v8 = vpop.xlane.xlu0 %283 }
 0x27f   :  { %v295_v9 = vmul.f32 0.06666667, %v290_v6  ;;  %v293_v10 = vmul.f32 0.06666667, %v284_v8 }
 0x281   :  { %711 = vrsqrt.f32 %v295_v9  ;;  %vm319_vm6 = vcmp.eq.f32.partialorder %v295_v9, inf  ;;  %vm321_vm7 = vcmp.eq.f32.partialorder %v295_v9, 0.0  ;;  %v322_v23 = vand.u32 2147483648, %v295_v9 }
 0x282   :  { %713 = vrsqrt.f32 %v293_v10  ;;  %v287_v12 = vpop.xlane.xlu0 %286  ;;  %vm305_vm2 = vcmp.eq.f32.partialorder %v293_v10, inf  ;;  %v308_v27 = vand.u32 2147483648, %v293_v10  ;;  %vm307_vm3 = vcmp.eq.f32.partialorder %v293_v10, 0.0 }
 0x283   :  { %v294_v13 = vmul.f32 0.06666667, %v287_v12 }
 0x285   :  { %715 = vrsqrt.f32 %v294_v13  ;;  %v315_v37 = vand.u32 2147483648, %v294_v13 }
 0x28a   :  { %v710_v14 = vpop.eup %709 }
 0x28b   :  { %v297_v15 = vmul.f32 %v710_v14, %v292_v5 }
 0x28d   :  { %v299_v17 = vsel %vm298_vm9, %v292_v5, %v297_v15  ;;  %vm312_vm9 = vcmp.eq.f32.partialorder %v294_v13, inf }
 0x28e   :  { %v712_v18 = vpop.eup %711  ;;  %v302_v19 = vsel %vm300_vm5, %v301_v16, %v299_v17  ;;  %vm314_vm5 = vcmp.eq.f32.partialorder %v294_v13, 0.0 }
 0x28f   :  { %v714_v20 = vpop.eup %713  ;;  %v324_v21 = vadd.f32 1e-05, %v302_v19  ;;  %v318_v22 = vmul.f32 %v712_v18, %v295_v9 }
 0x290   :  { %v304_v25 = vmul.f32 %v714_v20, %v293_v10 }
 0x291   :  { %717 = vrcp.f32 %v324_v21  ;;  %v320_v26 = vsel %vm319_vm6, %v295_v9, %v318_v22  ;;  %v673_v21 = vld [vmem:[%s1043_s3 + $0x1] ss:$0 sm:$0xff] }
 0x292   :  { %v716_v28 = vpop.eup %715  ;;  %v323_v29 = vsel %vm321_vm7, %v322_v23, %v320_v26  ;;  %v306_v30 = vsel %vm305_vm2, %v293_v10, %v304_v25 }
 0x293   :  { %v327_v33 = vadd.f32 1e-05, %v323_v29  ;;  %v309_v34 = vsel %vm307_vm3, %v308_v27, %v306_v30  ;;  %v311_v35 = vmul.f32 %v716_v28, %v294_v13 }
 0x294   :  { %v325_v36 = vadd.f32 1e-05, %v309_v34 }
 0x295   :  { %719 = vrcp.f32 %v327_v33  ;;  %v313_v38 = vsel %vm312_vm9, %v294_v13, %v311_v35  ;;  %v672_v33 = vld [vmem:[%s1043_s3] ss:$0 sm:$0xff] }
 0x296   :  { %721 = vrcp.f32 %v325_v36  ;;  %v316_v40 = vsel %vm314_vm5, %v315_v37, %v313_v38 }
 0x297   :  { %v326_v41 = vadd.f32 1e-05, %v316_v40 }
 0x299   :  { %723 = vrcp.f32 %v326_v41 }
 0x29e   :  { %v718_v42 = vpop.eup %717 }
 0x29f   :  { %v336_v44 = vmul.f32 %v718_v42, %v905_v47 }
 0x2a1   :  { %v344_v48 = vmul.f32 %v666_v43, %v336_v44 }
 0x2a2   :  { %v720_v49 = vpop.eup %719 }
 0x2a3   :  { %v722_v50 = vpop.eup %721  ;;  %v339_v51 = vmul.f32 %v720_v49, %v911_v54  ;;  %v352_v52 = vadd.f32 %v667_v46, %v344_v48 }
 0x2a4   :  { %v337_v56 = vmul.f32 %v722_v50, %v909_v53 }
 0x2a5   :  { %v347_v57 = vmul.f32 %v666_v43, %v339_v51  ;;  %v360_v58 = vmul.f32 1.442695, %v352_v52  ;;  %vm356_vm3 = vcmp.gt.f32.partialorder %v352_v52, 0.0 }
 0x2a6   :  { %v724_v59 = vpop.eup %723  ;;  %v345_v61 = vmul.f32 %v666_v43, %v337_v56 }
 0x2a7   :  { %v338_v63 = vmul.f32 %v724_v59, %v918_v62  ;;  %v355_v0 = vadd.f32 %v667_v46, %v347_v57  ;;  %725 = vpow2.f32 %v360_v58 }
 0x2a8   :  { %v353_v47 = vadd.f32 %v667_v46, %v345_v61 }
 0x2a9   :  { %v346_v1 = vmul.f32 %v666_v43, %v338_v63  ;;  %v366_v2 = vmul.f32 1.442695, %v355_v0  ;;  %vm359_vm6 = vcmp.gt.f32.partialorder %v355_v0, 0.0  ;;  %v674_v43 = vld [vmem:[%s1043_s3 + $0x2] ss:$0 sm:$0xff] }
 0x2aa   :  { %v362_v3 = vmul.f32 1.442695, %v353_v47  ;;  %vm357_vm7 = vcmp.gt.f32.partialorder %v353_v47, 0.0 }
 0x2ab   :  { %v354_v4 = vadd.f32 %v667_v46, %v346_v1  ;;  %727 = vpow2.f32 %v366_v2 }
 0x2ac   :  { %729 = vpow2.f32 %v362_v3  ;;  %v675_v3 = vld [vmem:[%s1041_s5 + $0x2] ss:$0 sm:$0xff] }
 0x2ad   :  { %v364_v5 = vmul.f32 1.442695, %v354_v4  ;;  %vm358_vm2 = vcmp.gt.f32.partialorder %v354_v4, 0.0 }
 0x2af   :  { %731 = vpow2.f32 %v364_v5 }
 0x2b4   :  { %v726_v54 = vpop.eup %725 }
 0x2b5   :  { %v668_v6 = vadd.f32 -1.0, %v726_v54 }
 0x2b7   :  { %v372_v53 = vmul.f32 1.6732632, %v668_v6 }
 0x2b8   :  { %v728_v8 = vpop.eup %727 }
 0x2b9   :  { %v730_v9 = vpop.eup %729  ;;  %v671_v10 = vadd.f32 -1.0, %v728_v8  ;;  %v376_v12 = vsel %vm356_vm3, %v352_v52, %v372_v53 }
 0x2ba   :  { %v669_v62 = vadd.f32 -1.0, %v730_v9  ;;  %v380_v16 = vmul.f32 1.050701, %v376_v12 }
 0x2bb   :  { %v375_v13 = vmul.f32 1.6732632, %v671_v10 }
 0x2bc   :  { %v732_v14 = vpop.eup %731  ;;  %v373_v15 = vmul.f32 1.6732632, %v669_v62  ;;  %v384_v25 = vrot.slane %v380_v16, 6  ;;  %v418_v27 = vrot.slane %v380_v16, 2  ;;  %v410_v37 = vmul.f32 %v673_v21, %v380_v16 }
 0x2bd   :  { %v670_v17 = vadd.f32 -1.0, %v732_v14  ;;  %v379_v18 = vsel %vm359_vm6, %v355_v0, %v375_v13 }
 0x2be   :  { %v377_v19 = vsel %vm357_vm7, %v353_v47, %v373_v15  ;;  %v383_v20 = vmul.f32 1.050701, %v379_v18 }
 0x2bf   :  { %v374_v22 = vmul.f32 1.6732632, %v670_v17  ;;  %v381_v23 = vmul.f32 1.050701, %v377_v19 }
 0x2c0   :  { %v387_v26 = vrot.slane %v383_v20, 6  ;;  %v421_v28 = vrot.slane %v383_v20, 2  ;;  %v413_v44 = vmul.f32 %v673_v21, %v383_v20 }
 0x2c1   :  { %v378_v29 = vsel %vm358_vm2, %v354_v4, %v374_v22  ;;  %v385_v30 = vrot.slane %v381_v23, 6  ;;  %v419_v34 = vrot.slane %v381_v23, 2  ;;  %v411_v52 = vmul.f32 %v673_v21, %v381_v23 }
 0x2c2   :  { %v382_v35 = vmul.f32 1.050701, %v378_v29  ;;  %v391_v36 = vsel %vm49_vm8, %v387_v26, %v384_v25  ;;  %v425_v38 = vsel %vm120_vm11, %v421_v28, %v418_v27 }
 0x2c3   :  { %v390_v40 = vsel %vm49_vm8, %v384_v25, %v385_v30  ;;  %v392_v41 = vsel %vm86_vm10, %v391_v36, 0.0  ;;  %v424_v42 = vsel %vm120_vm11, %v418_v27, %v419_v34  ;;  %v429_v56 = vsel %vm160_vm1, %v425_v38, 0.0 }
 0x2c4   :  { %v393_v46 = vsel %vm87_vm14, %v390_v40, 0.0  ;;  %v401_v48 = vmul.f32 %v672_v33, %v392_v41  ;;  %v420_v49 = vrot.slane %v382_v35, 2  ;;  %v426_v50 = vsel %vm157_vm0, %v424_v42, 0.0 }
 0x2c5   :  { %v402_v51 = vmul.f32 %v672_v33, %v393_v46  ;;  %v386_v32 = vrot.slane %v382_v35, 6  ;;  %v435_v59 = vmul.f32 %v674_v43, %v426_v50  ;;  %v412_v5 = vmul.f32 %v673_v21, %v382_v35 }
 0x2c6   :  { %v414_v57 = vadd.f32 %v410_v37, %v401_v48  ;;  %v423_v58 = vsel %vm120_vm11, %v419_v34, %v420_v49  ;;  %v422_v45 = vsel %vm120_vm11, %v420_v49, %v421_v28  ;;  %v438_v9 = vmul.f32 %v674_v43, %v429_v56 }
 0x2c7   :  { %v415_v61 = vadd.f32 %v411_v52, %v402_v51  ;;  %v427_v63 = vsel %vm158_vm15, %v423_v58, 0.0  ;;  %v388_v60 = vsel %vm49_vm8, %v386_v32, %v387_v26  ;;  %v389_v0 = vsel %vm49_vm8, %v385_v30, %v386_v32 }
 0x2c8   :  { %v436_v7 = vmul.f32 %v674_v43, %v427_v63  ;;  %v439_v47 = vadd.f32 %v435_v59, %v414_v57  ;;  %v394_v1 = vsel %vm88_vm13, %v389_v0, 0.0  ;;  %v395_v2 = vsel %vm89_vm12, %v388_v60, 0.0 }
 0x2c9   :  { %v403_v55 = vmul.f32 %v672_v33, %v394_v1  ;;  %v404_v4 = vmul.f32 %v672_v33, %v395_v2  ;;  %v428_v54 = vsel %vm159_vm4, %v422_v45, 0.0  ;;  %vm1046_vm8 = vcmask 130048  }
 0x2ca   :  { %v440_v24 = vadd.f32 %v436_v7, %v415_v61  ;;  %v437_v8 = vmul.f32 %v674_v43, %v428_v54  ;;  %v447_v31 = vadd.f32 %v675_v3, %v439_v47  ;;  %vm1047_vm10 = vmmov %vm1046_vm8  ;;  %vm520_vm11 = vcmask 31744  }
 0x2cb   :  { %v416_v6 = vadd.f32 %v412_v5, %v403_v55  ;;  %v417_v53 = vadd.f32 %v413_v44, %v404_v4 }
 0x2cc   :  { %v448_v10 = vadd.f32 %v675_v3, %v440_v24 }
 0x2cd   :  { %v441_v12 = vadd.f32 %v437_v8, %v416_v6  ;;  %v442_v39 = vadd.f32 %v438_v9, %v417_v53 }
 0x2ce   :  { %v451_v62 = vpack.c.bf16 %v448_v10, %v447_v31 }
 0x2cf   :  { %v449_v13 = vadd.f32 %v675_v3, %v441_v12  ;;  %v450_v14 = vadd.f32 %v675_v3, %v442_v39 }
 0x2d0   :  { %700 = vmatprep.mubr.msk.bf16.mxu1 %vm1046_vm8, %v451_v62 }
 0x2d1   :  { %v452_v15 = vpack.c.bf16 %v450_v14, %v449_v13 }
 0x2d3   :  { %701 = vmatmul.mubr.msk.bf16.vlgmr.msra.gmra.mxu1 %vm1047_vm10, %v452_v15 }
 0x393   :  { %v702_v16 = vpop.f32.mrf.mxu1 }
 0x394   :  { %v514_v20 = vadd.f32 %v702_v16, %v676_v11 }
 0x395   :  { %v505_v17 = vpop.f32.mrf.mxu1 }
 0x396   :  { %v506_v18 = vadd.f32 %v676_v11, %v505_v17  ;;  %v527_v27 = vsel %vm520_vm11, %v514_v20, 0.0  ;;  %v680_v17 = vld [vmem:[%s1041_s5 + $0x6] ss:$0 sm:$0xff] }
 0x397   :  { %v703_v19 = vpop.f32.mrf.mxu1 }
 0x398   :  { %v521_v21 = vsel %vm520_vm11, %v506_v18, 0.0  ;;  %v517_v25 = vadd.f32 %v703_v19, %v676_v11  ;;  %v681_v19 = vld [vmem:[%s1041_s5 + $0x7] ss:$0 sm:$0xff] }
 0x399   :  { %v508_v22 = vpop.f32.mrf.mxu1  ;;  %522 = vadd.xlane.f32.xlu1 %v521_v21 }
 0x39a   :  { %v509_v23 = vadd.f32 %v676_v11, %v508_v22  ;;  %v530_v28 = vsel %vm520_vm11, %v517_v25, 0.0 }
 0x39c   :  { %v524_v26 = vsel %vm520_vm11, %v509_v23, 0.0 }
 0x39d   :  { %525 = vadd.xlane.f32.xlu0 %v524_v26  ;;  %528 = vadd.xlane.f32.xlu1 %v527_v27 }
 0x3a1   :  { %531 = vadd.xlane.f32.xlu0 %v530_v28 }
 0x422   :  { %v523_v29 = vpop.xlane.xlu1 %522 }
 0x423   :  { %v534_v30 = vmul.f32 0.25, %v523_v29 }
 0x425   :  { %v991_v33 = vsub.f32 %v506_v18, %v534_v30 }
 0x426   :  { %v526_v34 = vpop.xlane.xlu0 %525  ;;  %v529_v35 = vpop.xlane.xlu1 %528 }
 0x427   :  { %v535_v36 = vmul.f32 0.25, %v526_v34  ;;  %v536_v37 = vmul.f32 0.25, %v529_v35  ;;  %v542_v38 = vmul.f32 %v991_v33, %v991_v33 }
 0x429   :  { %v995_v40 = vsub.f32 %v509_v23, %v535_v36  ;;  %v997_v41 = vsub.f32 %v514_v20, %v536_v37  ;;  %v546_v42 = vsel %vm520_vm11, %v542_v38, 0.0 }
 0x42a   :  { %v532_v43 = vpop.xlane.xlu0 %531  ;;  %547 = vadd.xlane.f32.xlu1 %v546_v42 }
 0x42b   :  { %v537_v44 = vmul.f32 0.25, %v532_v43  ;;  %v543_v46 = vmul.f32 %v995_v40, %v995_v40  ;;  %v544_v48 = vmul.f32 %v997_v41, %v997_v41 }
 0x42d   :  { %v1004_v49 = vsub.f32 %v517_v25, %v537_v44  ;;  %v549_v50 = vsel %vm520_vm11, %v543_v46, 0.0  ;;  %v552_v51 = vsel %vm520_vm11, %v544_v48, 0.0 }
 0x42e   :  { %550 = vadd.xlane.f32.xlu0 %v549_v50  ;;  %553 = vadd.xlane.f32.xlu1 %v552_v51 }
 0x42f   :  { %v545_v52 = vmul.f32 %v1004_v49, %v1004_v49 }
 0x431   :  { %v555_v32 = vsel %vm520_vm11, %v545_v52, 0.0 }
 0x432   :  { %556 = vadd.xlane.f32.xlu0 %v555_v32 }
 0x4b3   :  { %v548_v56 = vpop.xlane.xlu1 %547 }
 0x4b4   :  { %v559_v57 = vmul.f32 0.33333334, %v548_v56 }
 0x4b6   :  { %733 = vrsqrt.f32 %v559_v57  ;;  %vm565_vm12 = vcmp.eq.f32.partialorder %v559_v57, inf  ;;  %v568_v47 = vand.u32 2147483648, %v559_v57  ;;  %vm567_vm13 = vcmp.eq.f32.partialorder %v559_v57, 0.0 }
 0x4b7   :  { %v551_v58 = vpop.xlane.xlu0 %550  ;;  %v554_v59 = vpop.xlane.xlu1 %553 }
 0x4b8   :  { %v560_v45 = vmul.f32 0.33333334, %v551_v58  ;;  %v561_v61 = vmul.f32 0.33333334, %v554_v59 }
 0x4ba   :  { %735 = vrsqrt.f32 %v560_v45  ;;  %vm572_vm14 = vcmp.eq.f32.partialorder %v560_v45, inf  ;;  %vm574_vm15 = vcmp.eq.f32.partialorder %v560_v45, 0.0  ;;  %v575_v54 = vand.u32 2147483648, %v560_v45 }
 0x4bb   :  { %737 = vrsqrt.f32 %v561_v61  ;;  %v557_v63 = vpop.xlane.xlu0 %556  ;;  %vm579_vm0 = vcmp.eq.f32.partialorder %v561_v61, inf  ;;  %v582_v53 = vand.u32 2147483648, %v561_v61  ;;  %vm581_vm1 = vcmp.eq.f32.partialorder %v561_v61, 0.0 }
 0x4bc   :  { %v562_v60 = vmul.f32 0.33333334, %v557_v63 }
 0x4be   :  { %739 = vrsqrt.f32 %v562_v60  ;;  %vm586_vm4 = vcmp.eq.f32.partialorder %v562_v60, inf  ;;  %v589_v13 = vand.u32 2147483648, %v562_v60  ;;  %vm588_vm9 = vcmp.eq.f32.partialorder %v562_v60, 0.0 }
 0x4c3   :  { %v734_v0 = vpop.eup %733 }
 0x4c4   :  { %v564_v7 = vmul.f32 %v734_v0, %v559_v57 }
 0x4c6   :  { %v566_v1 = vsel %vm565_vm12, %v559_v57, %v564_v7 }
 0x4c7   :  { %v736_v2 = vpop.eup %735  ;;  %v569_v3 = vsel %vm567_vm13, %v568_v47, %v566_v1 }
 0x4c8   :  { %v738_v55 = vpop.eup %737  ;;  %v591_v4 = vadd.f32 1e-05, %v569_v3  ;;  %v571_v5 = vmul.f32 %v736_v2, %v560_v45 }
 0x4c9   :  { %v578_v24 = vmul.f32 %v738_v55, %v561_v61 }
 0x4ca   :  { %741 = vrcp.f32 %v591_v4  ;;  %v573_v6 = vsel %vm572_vm14, %v560_v45, %v571_v5 }
 0x4cb   :  { %v740_v8 = vpop.eup %739  ;;  %v576_v9 = vsel %vm574_vm15, %v575_v54, %v573_v6  ;;  %v580_v31 = vsel %vm579_vm0, %v561_v61, %v578_v24 }
 0x4cc   :  { %v592_v10 = vadd.f32 1e-05, %v576_v9  ;;  %v583_v12 = vsel %vm581_vm1, %v582_v53, %v580_v31  ;;  %v585_v39 = vmul.f32 %v740_v8, %v562_v60 }
 0x4cd   :  { %v593_v62 = vadd.f32 1e-05, %v583_v12 }
 0x4ce   :  { %743 = vrcp.f32 %v592_v10  ;;  %v587_v14 = vsel %vm586_vm4, %v562_v60, %v585_v39 }
 0x4cf   :  { %745 = vrcp.f32 %v593_v62  ;;  %v590_v15 = vsel %vm588_vm9, %v589_v13, %v587_v14 }
 0x4d0   :  { %v594_v16 = vadd.f32 1e-05, %v590_v15 }
 0x4d2   :  { %747 = vrcp.f32 %v594_v16 }
 0x4d7   :  { %v742_v11 = vpop.eup %741 }
 0x4d8   :  { %v603_v18 = vmul.f32 %v742_v11, %v991_v33 }
 0x4da   :  { %v611_v20 = vmul.f32 %v680_v17, %v603_v18 }
 0x4db   :  { %v744_v21 = vpop.eup %743 }
 0x4dc   :  { %v746_v22 = vpop.eup %745  ;;  %v619_v23 = vadd.f32 %v681_v19, %v611_v20  ;;  %v604_v25 = vmul.f32 %v744_v21, %v995_v40 }
 0x4dd   :  { %v605_v26 = vmul.f32 %v746_v22, %v997_v41 }
 0x4de   :  { %v627_v27 = vmul.f32 1.442695, %v619_v23  ;;  %v612_v28 = vmul.f32 %v680_v17, %v604_v25  ;;  %vm623_vm5 = vcmp.gt.f32.partialorder %v619_v23, 0.0 }
 0x4df   :  { %v748_v29 = vpop.eup %747  ;;  %v613_v30 = vmul.f32 %v680_v17, %v605_v26 }
 0x4e0   :  { %749 = vpow2.f32 %v627_v27  ;;  %v620_v34 = vadd.f32 %v681_v19, %v612_v28  ;;  %v606_v33 = vmul.f32 %v748_v29, %v1004_v49 }
 0x4e1   :  { %v621_v35 = vadd.f32 %v681_v19, %v613_v30 }
 0x4e2   :  { %v629_v36 = vmul.f32 1.442695, %v620_v34  ;;  %v614_v37 = vmul.f32 %v680_v17, %v606_v33  ;;  %vm624_vm3 = vcmp.gt.f32.partialorder %v620_v34, 0.0 }
 0x4e3   :  { %v631_v38 = vmul.f32 1.442695, %v621_v35  ;;  %vm625_vm6 = vcmp.gt.f32.partialorder %v621_v35, 0.0 }
 0x4e4   :  { %751 = vpow2.f32 %v629_v36  ;;  %v622_v42 = vadd.f32 %v681_v19, %v614_v37 }
 0x4e5   :  { %753 = vpow2.f32 %v631_v38 }
 0x4e6   :  { %v633_v43 = vmul.f32 1.442695, %v622_v42  ;;  %vm626_vm7 = vcmp.gt.f32.partialorder %v622_v42, 0.0 }
 0x4e8   :  { %755 = vpow2.f32 %v633_v43 }
 0x4ed   :  { %v750_v40 = vpop.eup %749 }
 0x4ee   :  { %v682_v44 = vadd.f32 -1.0, %v750_v40 }
 0x4f0   :  { %v639_v41 = vmul.f32 1.6732632, %v682_v44 }
 0x4f1   :  { %v752_v46 = vpop.eup %751 }
 0x4f2   :  { %v754_v48 = vpop.eup %753  ;;  %v643_v50 = vsel %vm623_vm5, %v619_v23, %v639_v41  ;;  %v683_v51 = vadd.f32 -1.0, %v752_v46 }
 0x4f3   :  { %v647_v52 = vmul.f32 1.050701, %v643_v50  ;;  %v684_v32 = vadd.f32 -1.0, %v754_v48 }
 0x4f4   :  { %v640_v49 = vmul.f32 1.6732632, %v683_v51 }
 0x4f5   :  { %v756_v56 = vpop.eup %755  ;;  %651 = vst.msk [vmem:[%s1044_s7] sm:$0xff] %vm520_vm11, %v647_v52  ;;  %v641_v57 = vmul.f32 1.6732632, %v684_v32 }
 0x4f6   :  { %v644_v58 = vsel %vm624_vm3, %v620_v34, %v640_v49  ;;  %v685_v59 = vadd.f32 -1.0, %v756_v56 }
 0x4f7   :  { %v648_v45 = vmul.f32 1.050701, %v644_v58  ;;  %v645_v61 = vsel %vm625_vm6, %v621_v35, %v641_v57 }
 0x4f8   :  { %v649_v63 = vmul.f32 1.050701, %v645_v61  ;;  %v642_v60 = vmul.f32 1.6732632, %v685_v59 }
 0x4f9   :  { %652 = vst.msk [vmem:[%s1044_s7 + $0x8] sm:$0xff] %vm520_vm11, %v648_v45 }
 0x4fa   :  { %653 = vst.msk [vmem:[%s1044_s7 + $0x10] sm:$0xff] %vm520_vm11, %v649_v63  ;;  %v646_v0 = vsel %vm626_vm7, %v622_v42, %v642_v60 }
 0x4fb   :  { %v650_v7 = vmul.f32 1.050701, %v646_v0 }
 0x4fd   :  { %654 = vst.msk [vmem:[%s1044_s7 + $0x18] sm:$0xff] %vm520_vm11, %v650_v7 }

</bundles_post_ra>
